<compile_context>
chip_gen: v7x
topology: tpu7x:2x2x1
jax: 0.10.0
libtpu: 0.0.40
codegen_flags: <defaults>
</compile_context>

<pallas_src>
import math
import functools

import jax
import jax.numpy as jnp
import numpy as np
from jax.experimental import pallas as pl
from jax.experimental.pallas import tpu as pltpu


_LANE = 128  # TPU vreg lane width


def build_pe_table(code_size: int, max_seq_len: int = 128,
                   max_wavelength: float = 10000.0) -> jnp.ndarray:
    """Positional-encoding buffer, identical to the PyTorch double loop.

    pe[pos, i]   = sin(pi * pos / max_wavelength ** (2*i / code_size))   (i even)
    pe[pos, i+1] = cos(pi * pos / max_wavelength ** (2*i / code_size))
    (the pi factor intentionally mirrors the PyTorch module, which also
    requires an even code_size -- odd code_size would index out of bounds.)
    Returns shape (max_seq_len, code_size), float32.
    """
    assert code_size % 2 == 0, "PositionalEncoder requires even code_size"
    pos = np.arange(max_seq_len, dtype=np.float64)[:, None]           # (S, 1)
    i_even = np.arange(0, code_size, 2, dtype=np.float64)[None, :]    # (1, C/2)
    denom = max_wavelength ** (2.0 * i_even / code_size)              # (1, C/2)
    angles = np.pi * pos / denom                                      # (S, C/2)
    pe = np.zeros((max_seq_len, code_size), dtype=np.float32)
    pe[:, 0::2] = np.sin(angles)
    pe[:, 1::2] = np.cos(angles)
    return jnp.asarray(pe)


def _pe_add_kernel(x_ref, pe_ref, o_ref, *, scale):
    # Elementwise o = x * scale + pe on a lane-dense (tile_rows, 128) block.
    # Explicit cast keeps the store path in the output dtype even if a
    # promotion sneaks in (e.g. bf16 inputs).
    o_ref[...] = (x_ref[...] * scale + pe_ref[...]).astype(o_ref.dtype)


def positional_encoder_forward(x: jnp.ndarray, pe_table: jnp.ndarray) -> jnp.ndarray:
    """x: (seq_len, batch, code_size).  pe_table: (max_seq_len, code_size)."""
    seq_len, batch, code_size = x.shape
    assert pe_table.shape[1] == code_size
    assert seq_len <= pe_table.shape[0]
    dtype = x.dtype
    itemsize = jnp.dtype(dtype).itemsize
    scale = float(math.sqrt(code_size))

    # Broadcast pe over batch in the wrapper and match x's dtype so the kernel
    # never promotes/downcasts on the store path.  (Costs one extra x-sized
    # read -- accepted trade-off for a fully lane-dense layout.)
    pe = jnp.broadcast_to(pe_table[:seq_len].astype(dtype)[:, None, :],
                          (seq_len, batch, code_size))

    # ---- lane-dense 2-D view: (rows, 128) --------------------------------
    flat = seq_len * batch * code_size
    rows = pl.cdiv(flat, _LANE)

    # ~1 MiB tiles (multiple of 8 sublanes); a single full-extent block when
    # the problem is smaller than one tile.
    target_rows = max(8, (1 << 20) // (_LANE * itemsize))   # 2048 rows for f32
    tile_rows = rows if rows <= target_rows else target_rows
    grid_rows = pl.cdiv(rows, tile_rows)
    rows_padded = grid_rows * tile_rows
    padded_flat = rows_padded * _LANE

    x_flat = jnp.reshape(x, (flat,))
    pe_flat = jnp.reshape(pe, (flat,))
    if padded_flat != flat:
        x_flat = jnp.pad(x_flat, (0, padded_flat - flat))
        pe_flat = jnp.pad(pe_flat, (0, padded_flat - flat))
    x2 = x_flat.reshape(rows_padded, _LANE)
    pe2 = pe_flat.reshape(rows_padded, _LANE)

    out2 = pl.pallas_call(
        functools.partial(_pe_add_kernel, scale=scale),
        out_shape=jax.ShapeDtypeStruct((rows_padded, _LANE), dtype),
        grid=(grid_rows,),
        in_specs=[
            pl.BlockSpec((tile_rows, _LANE), lambda i: (i, 0)),
            pl.BlockSpec((tile_rows, _LANE), lambda i: (i, 0)),
        ],
        out_specs=pl.BlockSpec((tile_rows, _LANE), lambda i: (i, 0)),
        compiler_params=pltpu.CompilerParams(
            dimension_semantics=("parallel",),       # megacore / v7x 2-TC sharding
            vmem_limit_bytes=32 * 1024 * 1024,       # explicit, safe on v5e/v6e/v7x
        ),
        cost_estimate=pl.CostEstimate(
            flops=2 * flat,                          # mul + add per element
            transcendentals=0,
            bytes_accessed=3 * flat * itemsize,      # read x, read pe, write out
        ),
    )(x2, pe2)

    return out2.reshape(padded_flat)[:flat].reshape(seq_len, batch, code_size)


if __name__ == "__main__":
    # Small shapes consistent with the module: seq=8, batch=2, code_size=32.
    code_size = 32
    max_seq_len = 128
    seq_len = 8
    batch = 2

    key = jax.random.PRNGKey(0)
    x = jax.random.normal(key, (seq_len, batch, code_size), dtype=jnp.float32)
    pe_table = build_pe_table(code_size, max_seq_len)

    out = jax.block_until_ready(positional_encoder_forward(x, pe_table))

    # Pure-JAX reference (mirrors the PyTorch forward).
    ref = x * math.sqrt(code_size) + pe_table[:seq_len][:, None, :]
    np.testing.assert_allclose(np.asarray(out), np.asarray(ref), rtol=1e-6, atol=1e-6)

    # Extra shapes: one exercising the 128-lane padding path, one exercising
    # the multi-tile 'parallel' grid path.
    for shape in [(10, 3, code_size), (128, 80, code_size)]:
        s, b, _ = shape
        xi = jax.random.normal(jax.random.PRNGKey(1), shape, dtype=jnp.float32)
        oi = jax.block_until_ready(positional_encoder_forward(xi, pe_table))
        ri = xi * math.sqrt(code_size) + pe_table[:s][:, None, :]
        np.testing.assert_allclose(np.asarray(oi), np.asarray(ri), rtol=1e-6, atol=1e-6)

    print("KERNEL_OK")
</pallas_src>

<mosaic_0001>
module attributes {stable_mosaic.version = 11 : i64} {
  func.func @_pe_add_kernel(%arg0: i32, %arg1: memref<4x128xf32, #tpu.memory_space<vmem>>, %arg2: memref<4x128xf32, #tpu.memory_space<vmem>>, %arg3: memref<4x128xf32, #tpu.memory_space<vmem>>) attributes {dimension_semantics = [#tpu.dimension_semantics<parallel>], iteration_bounds = array<i64: 1>, scalar_prefetch = 0 : i64, scratch_operands = 0 : i64, tpu.core_type = #tpu.core_type<tc>, window_params = [{transform_indices = @transform_0, window_bounds = array<i64: 4, 128>}, {transform_indices = @transform_1, window_bounds = array<i64: 4, 128>}, {transform_indices = @transform_2, window_bounds = array<i64: 4, 128>}]} {
    %c0 = arith.constant 0 : index
    %c0_0 = arith.constant 0 : index
    %0 = vector.load %arg1[%c0, %c0_0] : memref<4x128xf32, #tpu.memory_space<vmem>>, vector<4x128xf32>
    %cst = arith.constant 5.65685415 : f32
    %1 = vector.broadcast %cst : f32 to vector<4x128xf32>
    %2 = arith.mulf %0, %1 : vector<4x128xf32>
    %c0_1 = arith.constant 0 : index
    %c0_2 = arith.constant 0 : index
    %3 = vector.load %arg2[%c0_1, %c0_2] : memref<4x128xf32, #tpu.memory_space<vmem>>, vector<4x128xf32>
    %4 = arith.addf %2, %3 : vector<4x128xf32>
    %c0_3 = arith.constant 0 : index
    %c0_4 = arith.constant 0 : index
    %5 = vector.load %arg3[%c0_3, %c0_4] : memref<4x128xf32, #tpu.memory_space<vmem>>, vector<4x128xf32>
    tpu.vector_store %arg3[%c0_3, %c0_4], %4 {strides = array<i32>} : memref<4x128xf32, #tpu.memory_space<vmem>>, vector<4x128xf32>,
    return
  }
  func.func @transform_0(%arg0: i32) -> (i32, i32) {
    %c0_i32 = arith.constant 0 : i32
    %c0_i32_0 = arith.constant 0 : i32
    return %arg0, %c0_i32 : i32, i32
  }
  func.func @transform_1(%arg0: i32) -> (i32, i32) {
    %c0_i32 = arith.constant 0 : i32
    %c0_i32_0 = arith.constant 0 : i32
    return %arg0, %c0_i32 : i32, i32
  }
  func.func @transform_2(%arg0: i32) -> (i32, i32) {
    %c0_i32 = arith.constant 0 : i32
    %c0_i32_0 = arith.constant 0 : i32
    return %arg0, %c0_i32 : i32, i32
  }
}

</mosaic_0001>

<bundles_post_ra>
// kernel: tpu_custom_call.1
= control target key start
LH: loop header
LB: loop body
LE: loop exit
PB: predicated region body
PF: predicated region fallthrough
CT: control target
= control target key end

     0   :  { %7 = vsyncpa [#allocation3], 0  ;;  %s186_s0 = inlined_call_operand.hbm [shape: f32[4,128], index: 0, kind: input, shape index: {}]   ;;  %s187_s1 = inlined_call_operand.hbm [shape: f32[4,128], index: 1, kind: input, shape index: {}]   ;;  %s188_s2 = inlined_call_operand.hbm [shape: f32[4,128], index: 2, kind: output, shape index: {}]  }
   0x1   :  { %8 = vsyncpa [#allocation6], 0 }
   0x2   :  { %9 = vsyncpa [#allocation4], 0  ;;  %s132_s9 = smov [#allocation2]   ;;  %s133_s11 = smov [#allocation5]  }
   0x3   :  { %s16_s10 = sshll.u32 %s132_s9, 4  ;;  %s26_s12 = sshll.u32 %s133_s11, 4  ;;  %s17_s10 = int_to_ptr.vmem [resolvable:$true] %s16_s10  ;;  %s27_s12 = int_to_ptr.vmem [resolvable:$true] %s26_s12 }
   0x4   :  { %s60_s15 = scalar_lea.hbm %s186_s0, 64 }
   0x5   :  { %p61_p0 = scmp.ne.s32.totalorder %s186_s0, %s60_s15  ;;  %p64_p1 = scmp.lt.u32.totalorder %s60_s15, %s186_s0 }
   0x7   :  { %p66_p2 = pnand %p64_p1, %p61_p0 }
   0x9   :  { %69 = shalt.err (!%p66_p2)
}
   0xa   :  { %s70_s20 = scalar_lea.vmem %s17_s10, 64  ;;  %p75_p4 = scmp.lt.s32.totalorder %s17_s10, %s17_s10 }
   0xb   :  { %p71_p3 = scmp.ne.s32.totalorder %s17_s10, %s70_s20  ;;  %p76_p5 = scmp.lt.s32.totalorder %s70_s20, %s70_s20 }
   0xd   :  { %p77_p6 = por %p76_p5, %p75_p4 }
   0xf   :  { %p78_p7 = pnand %p77_p6, %p71_p3 }
  0x11   :  { %81 = shalt.err (!%p78_p7)
}
  0x12   :  { %19 = dma.hbm_to_vmem [thread:$0]  %s186_s0, 64, %s17_s10, [#allocation3]  }
  0x13   :  { %s82_s25 = scalar_lea.hbm %s187_s1, 64 }
  0x14   :  { %p83_p8 = scmp.ne.s32.totalorder %s187_s1, %s82_s25  ;;  %p86_p9 = scmp.lt.u32.totalorder %s82_s25, %s187_s1 }
  0x16   :  { %p88_p10 = pnand %p86_p9, %p83_p8 }
  0x18   :  { %91 = shalt.err (!%p88_p10)
}
  0x19   :  { %s92_s30 = scalar_lea.vmem %s27_s12, 64  ;;  %p97_p12 = scmp.lt.s32.totalorder %s27_s12, %s27_s12 }
  0x1a   :  { %p93_p11 = scmp.ne.s32.totalorder %s27_s12, %s92_s30  ;;  %p98_p13 = scmp.lt.s32.totalorder %s92_s30, %s92_s30 }
  0x1c   :  { %p99_p0 = por %p98_p13, %p97_p12 }
  0x1e   :  { %p100_p1 = pnand %p99_p0, %p93_p11 }
  0x20   :  { %103 = shalt.err (!%p100_p1)
}
  0x21   :  { %29 = dma.hbm_to_vmem [thread:$0]  %s187_s1, 64, %s27_s12, [#allocation6]  }
  0x22   :  { %126 = dma.done.wait [#allocation3], 64  }
  0x23   :  { %127 = vsyncadd [#allocation3], 4294967232 }
  0x24   :  { %128 = dma.done.wait [#allocation6], 64  }
  0x25   :  { %129 = vsyncadd [#allocation6], 4294967232  ;;  %v36_v0 = vld [vmem:[#allocation2] sm:$0xf]  ;;  %v38_v1 = vld [vmem:[#allocation5] sm:$0xf] }
  0x26   :  { %s134_s4 = smov [#allocation7]   ;;  %v37_v2 = vmul.f32 5.656854, %v36_v0 }
  0x27   :  { %s47_s5 = sshll.u32 %s134_s4, 4  ;;  %s48_s5 = int_to_ptr.vmem [resolvable:$true] %s47_s5 }
  0x28   :  { %v39_v3 = vadd.f32 %v38_v1, %v37_v2  ;;  %s104_s6 = scalar_lea.vmem %s48_s5, 64  ;;  %p109_p3 = scmp.lt.s32.totalorder %s48_s5, %s48_s5 }
  0x29   :  { %p105_p2 = scmp.ne.s32.totalorder %s48_s5, %s104_s6  ;;  %p110_p4 = scmp.lt.s32.totalorder %s104_s6, %s104_s6 }
  0x2a   :  { %40 = vst [vmem:[#allocation7] sm:$0xf] %v39_v3 }
  0x2b   :  { %p111_p5 = por %p110_p4, %p109_p3 }
  0x2d   :  { %p112_p6 = pnand %p111_p5, %p105_p2 }
  0x2f   :  { %115 = shalt.err (!%p112_p6)
}
  0x30   :  { %s116_s8 = scalar_lea.hbm %s188_s2, 64 }
  0x31   :  { %p117_p7 = scmp.ne.s32.totalorder %s188_s2, %s116_s8  ;;  %p120_p8 = scmp.lt.u32.totalorder %s116_s8, %s188_s2 }
  0x33   :  { %p122_p9 = pnand %p120_p8, %p117_p7 }
  0x35   :  { %125 = shalt.err (!%p122_p9)
}
  0x36   :  { %50 = dma.vmem_to_hbm [thread:$0]  %s48_s5, 64, %s188_s2, [#allocation4]  }
  0x37   :  { %130 = dma.done.wait [#allocation4], 64  }
  0x38   :  { %131 = vsyncadd [#allocation4], 4294967232 }
  0x39   :  { %54 = vsyncpa [#allocation3], 1 }
  0x3a   :  { %55 = vsyncpa [#allocation6], 1 }
  0x3b   :  { %56 = vsyncpa [#allocation4], 1 }

</bundles_post_ra>
